<compile_context>
chip_gen: v7x
topology: tpu7x:2x2x1
jax: 0.10.0
libtpu: 0.0.40
codegen_flags: <defaults>
</compile_context>

<pallas_src>
import functools

import jax
import jax.numpy as jnp
import numpy as np
from jax.experimental import pallas as pl
from jax.experimental.pallas import tpu as pltpu


# ----------------------------------------------------------------------------
# Fused kernel body
# ----------------------------------------------------------------------------
def upsample_fused_kernel(x_ref, res_ref, interp_ref, mask_ref,
                          w1_ref, w2_ref, bias_ref, out_ref, *, W):
    # x_ref:      (1, cx, h*w)  bf16   low-res features, flattened spatially
    # res_ref:    (1, cr, H*W)  f32    skip connection, flattened spatially
    # interp_ref: (h*w, H*W)    bf16   bilinear align_corners interpolation matrix
    # mask_ref:   (9, H*W)      f32    per-tap validity masks (dy and dx edges)
    # w1_ref:     (9, cout, cin) bf16  conv1 weights per tap, BN scale folded
    # w2_ref:     (9, cout, cout) bf16 conv2 weights per tap, BN scale folded
    # bias_ref:   (cout, 2)     f32    folded conv-bias + BN shift for conv1/conv2
    # out_ref:    (1, cout, H*W) f32
    masks = mask_ref[...]                                  # (9, HW) f32
    HW = masks.shape[1]
    taps = [(dy, dx) for dy in (-1, 0, 1) for dx in (-1, 0, 1)]

    # --- bilinear upsample (align_corners=True) as one bf16 MXU matmul --------
    x_up = jnp.dot(x_ref[0], interp_ref[...],
                   preferred_element_type=jnp.float32)     # (cx, HW) f32

    # --- channel concat: one sublane-aligned stack (4 + 4 rows = one f32 tile) -
    f = jnp.concatenate([x_up, res_ref[0]], axis=0)        # (cin, HW) f32

    def conv3x3_bn_lrelu(z, w_taps_ref, bias_col):
        """3x3 / stride-1 / pad-1 conv + folded BN + LeakyReLU in (C, H*W) layout.

        Per tap: roll (XLU) -> validity mask (VPU, f32) -> bf16 cast -> small MXU
        matmul accumulated in f32 vregs.  No patch matrix is materialized.
        """
        acc = None
        for t, (dy, dx) in enumerate(taps):
            s = dy * W + dx                                # flat source offset
            if s == 0:
                tap = z                                    # center tap: no roll, mask all-ones
            else:
                # result[p] = z[p + s] (wrap), then zero out-of-image wrap via mask
                tap = pltpu.roll(z, shift=(-s) % HW, axis=1)
                tap = tap * masks[t:t + 1, :]
            term = jnp.dot(w_taps_ref[t], tap.astype(jnp.bfloat16),
                           preferred_element_type=jnp.float32)   # (cout, HW)
            acc = term if acc is None else acc + term
        y = acc + bias_col                                 # folded conv-bias + BN shift
        return jnp.where(y >= 0.0, y, 0.01 * y)            # LeakyReLU(0.01)

    bias = bias_ref[...]                                   # (cout, 2) f32
    h1 = conv3x3_bn_lrelu(f, w1_ref, bias[:, 0:1])
    h2 = conv3x3_bn_lrelu(h1, w2_ref, bias[:, 1:2])
    out_ref[0] = h2.astype(out_ref.dtype)


# ----------------------------------------------------------------------------
# Wrapper: one pallas_call, pure reshapes at the boundary
# ----------------------------------------------------------------------------
def upsample_forward(x_nchw, residual_nchw, kparams):
    interp_t, masks, w1, w2, biases = kparams
    N, cx, h, w = x_nchw.shape
    Nr, cr, H, W = residual_nchw.shape
    assert N == Nr
    HW = H * W
    cin = cx + cr
    cout = w1.shape[1]

    # NCHW -> (N, C, H*W): free reshape, lane-dense (H*W on the lane dim).
    x_flat = x_nchw.reshape(N, cx, h * w).astype(jnp.bfloat16)   # MXU input
    r_flat = residual_nchw.reshape(N, cr, HW)                    # stays f32 (elementwise path)

    kernel = functools.partial(upsample_fused_kernel, W=W)

    out_flat = pl.pallas_call(
        kernel,
        out_shape=jax.ShapeDtypeStruct((N, cout, HW), jnp.float32),
        grid_spec=pltpu.PrefetchScalarGridSpec(
            num_scalar_prefetch=0,
            grid=(N,),
            in_specs=[
                pl.BlockSpec((1, cx, h * w), lambda n: (n, 0, 0)),
                pl.BlockSpec((1, cr, HW), lambda n: (n, 0, 0)),
                pl.BlockSpec((h * w, HW), lambda n: (0, 0)),
                pl.BlockSpec((9, HW), lambda n: (0, 0)),
                pl.BlockSpec((9, cout, cin), lambda n: (0, 0, 0)),
                pl.BlockSpec((9, cout, cout), lambda n: (0, 0, 0)),
                pl.BlockSpec((cout, 2), lambda n: (0, 0)),
            ],
            out_specs=pl.BlockSpec((1, cout, HW), lambda n: (n, 0, 0)),
        ),
        compiler_params=pltpu.CompilerParams(
            dimension_semantics=("parallel",)),   # v7x: one image per TensorCore
    )(x_flat, r_flat, interp_t, masks, w1, w2, biases)

    return out_flat.reshape(N, cout, H, W)


# ----------------------------------------------------------------------------
# Host-side constant / parameter preparation
# ----------------------------------------------------------------------------
def _interp_matrix_1d(in_size, out_size):
    """(out_size, in_size) align_corners=True linear interpolation weights."""
    if out_size == 1:
        src = np.zeros((1,), np.float64)
    else:
        src = np.arange(out_size, dtype=np.float64) * ((in_size - 1) / (out_size - 1))
    i0 = np.clip(np.floor(src).astype(np.int64), 0, in_size - 1)
    i1 = np.clip(i0 + 1, 0, in_size - 1)
    frac = src - i0
    m = np.zeros((out_size, in_size), np.float64)
    m[np.arange(out_size), i0] += 1.0 - frac
    m[np.arange(out_size), i1] += frac
    return m


def make_interp_matrix(h, w, H, W):
    """(h*w, H*W) bf16 matrix M_T such that x_up_flat = x_flat @ M_T."""
    my = _interp_matrix_1d(h, H)                      # (H, h)
    mx = _interp_matrix_1d(w, W)                      # (W, w)
    m_full = np.kron(my, mx)                          # (H*W, h*w)
    return jnp.asarray(m_full.T, dtype=jnp.bfloat16)


def make_tap_masks(H, W):
    """(9, H*W) f32 validity masks for the 3x3 taps (covers dy AND dx edges)."""
    ys, xs = np.divmod(np.arange(H * W), W)
    rows = []
    for dy in (-1, 0, 1):
        for dx in (-1, 0, 1):
            valid = ((ys + dy >= 0) & (ys + dy < H) &
                     (xs + dx >= 0) & (xs + dx < W))
            rows.append(valid.astype(np.float32))
    return jnp.asarray(np.stack(rows, axis=0))


def pack_tap_weights(w_hwio, bn_scale):
    """(3,3,Cin,Cout) HWIO -> (9, Cout, Cin) bf16, tap-major, BN scale folded."""
    kh, kw, cin, cout = w_hwio.shape
    w = jnp.transpose(w_hwio, (0, 1, 3, 2)).reshape(kh * kw, cout, cin)
    return (w * bn_scale[None, :, None]).astype(jnp.bfloat16)


def fold_bn(conv_bias, gamma, beta, running_mean, running_var, eps=1e-5):
    scale = gamma / jnp.sqrt(running_var + eps)
    bias = (conv_bias - running_mean) * scale + beta
    return scale, bias


def make_params(key, in_features, out_features):
    """Deterministic synthetic params for Conv-BN-LReLU-Conv-BN-LReLU (eval mode)."""
    ks = jax.random.split(key, 8)

    def conv_init(k, cin, cout):
        fan_in = cin * 9
        bound = 1.0 / np.sqrt(fan_in)
        kw_, kb_ = jax.random.split(k)
        w = jax.random.uniform(kw_, (3, 3, cin, cout), jnp.float32, -bound, bound)
        b = jax.random.uniform(kb_, (cout,), jnp.float32, -bound, bound)
        return w, b

    w1, b1 = conv_init(ks[0], in_features, out_features)
    w2, b2 = conv_init(ks[1], out_features, out_features)
    g1 = 1.0 + 0.1 * jax.random.normal(ks[2], (out_features,), jnp.float32)
    be1 = 0.1 * jax.random.normal(ks[3], (out_features,), jnp.float32)
    m1 = 0.05 * jax.random.normal(ks[4], (out_features,), jnp.float32)
    v1 = 1.0 + 0.1 * jax.random.uniform(ks[5], (out_features,), jnp.float32)
    g2 = 1.0 + 0.1 * jax.random.normal(ks[6], (out_features,), jnp.float32)
    be2 = 0.1 * jax.random.normal(ks[7], (out_features,), jnp.float32)
    m2 = jnp.zeros((out_features,), jnp.float32)
    v2 = jnp.ones((out_features,), jnp.float32)

    s1, bias1 = fold_bn(b1, g1, be1, m1, v1)
    s2, bias2 = fold_bn(b2, g2, be2, m2, v2)
    return dict(w1=w1, w2=w2, s1=s1, b1=bias1, s2=s2, b2=bias2)


def prepare_kernel_params(raw, h, w, H, W):
    """Pack constants for the kernel: 5 consolidated operands."""
    w1 = pack_tap_weights(raw["w1"], raw["s1"])                      # (9, cout, cin) bf16
    w2 = pack_tap_weights(raw["w2"], raw["s2"])                      # (9, cout, cout) bf16
    biases = jnp.stack([raw["b1"], raw["b2"]], axis=1).astype(jnp.float32)  # (cout, 2)
    return (make_interp_matrix(h, w, H, W),                          # bf16 (h*w, H*W)
            make_tap_masks(H, W),                                    # f32  (9, H*W)
            w1, w2, biases)


# ----------------------------------------------------------------------------
# Pure-JAX f32 reference of the full forward (for correctness checking)
# ----------------------------------------------------------------------------
def bilinear_align_corners_ref(x_nchw, out_h, out_w):
    n, c, h, w = x_nchw.shape
    ys = (jnp.arange(out_h, dtype=jnp.float32) * ((h - 1) / (out_h - 1))
          if out_h > 1 else jnp.zeros((out_h,), jnp.float32))
    xs = (jnp.arange(out_w, dtype=jnp.float32) * ((w - 1) / (out_w - 1))
          if out_w > 1 else jnp.zeros((out_w,), jnp.float32))
    y0 = jnp.clip(jnp.floor(ys).astype(jnp.int32), 0, h - 1)
    x0 = jnp.clip(jnp.floor(xs).astype(jnp.int32), 0, w - 1)
    y1 = jnp.clip(y0 + 1, 0, h - 1)
    x1 = jnp.clip(x0 + 1, 0, w - 1)
    wy = (ys - y0.astype(jnp.float32))[None, None, :, None]
    wx = (xs - x0.astype(jnp.float32))[None, None, None, :]
    rows = x_nchw[:, :, y0, :] * (1.0 - wy) + x_nchw[:, :, y1, :] * wy
    return rows[:, :, :, x0] * (1.0 - wx) + rows[:, :, :, x1] * wx


def upsample_ref(x_nchw, residual_nchw, raw):
    H, W = residual_nchw.shape[2], residual_nchw.shape[3]
    x_up = bilinear_align_corners_ref(x_nchw, H, W)
    f = jnp.concatenate([x_up, residual_nchw], axis=1)

    def block(z, w_hwio, scale, bias):
        y = jax.lax.conv_general_dilated(
            z, w_hwio, window_strides=(1, 1), padding="SAME",
            dimension_numbers=("NCHW", "HWIO", "NCHW"))
        y = y * scale[None, :, None, None] + bias[None, :, None, None]
        return jnp.where(y >= 0.0, y, 0.01 * y)

    h1 = block(f, raw["w1"], raw["s1"], raw["b1"])
    return block(h1, raw["w2"], raw["s2"], raw["b2"])


if __name__ == "__main__":
    key = jax.random.PRNGKey(0)
    k_x, k_r, k_p = jax.random.split(key, 3)

    # Low-res feature map + full-res skip connection (matches UpSample.forward).
    x = jax.random.normal(k_x, (2, 4, 8, 8), jnp.float32)            # NCHW
    residual = jax.random.normal(k_r, (2, 4, 16, 16), jnp.float32)   # NCHW
    in_features, out_features = 8, 8                                  # 4 + 4 concat channels

    raw = make_params(k_p, in_features, out_features)
    kparams = prepare_kernel_params(raw, x.shape[2], x.shape[3],
                                    residual.shape[2], residual.shape[3])

    fwd = jax.jit(upsample_forward)
    out = jax.block_until_ready(fwd(x, residual, kparams))
    assert out.shape == (2, out_features, 16, 16), out.shape
    assert bool(jnp.all(jnp.isfinite(out)))

    # Check the fused Pallas forward against a pure-f32 JAX reference.
    # Tolerance is widened vs the pure-f32 variant because the kernel feeds the
    # MXU bf16 inputs (weights / interp / activations), per the perf review.
    want = upsample_ref(x, residual, raw)
    max_err = float(jnp.max(jnp.abs(out - want)))
    assert jnp.allclose(out, want, atol=5e-2, rtol=5e-2), max_err

    print("KERNEL_OK")
</pallas_src>

<mosaic_0001>
module attributes {stable_mosaic.version = 11 : i64} {
  func.func @upsample_fused_kernel(%arg0: i32, %arg1: memref<1x4x64xbf16, #tpu.memory_space<vmem>>, %arg2: memref<1x4x256xf32, #tpu.memory_space<vmem>>, %arg3: memref<64x256xbf16, #tpu.memory_space<vmem>>, %arg4: memref<9x256xf32, #tpu.memory_space<vmem>>, %arg5: memref<9x8x8xbf16, #tpu.memory_space<vmem>>, %arg6: memref<9x8x8xbf16, #tpu.memory_space<vmem>>, %arg7: memref<8x2xf32, #tpu.memory_space<vmem>>, %arg8: memref<1x8x256xf32, #tpu.memory_space<vmem>>) attributes {dimension_semantics = [#tpu.dimension_semantics<parallel>], iteration_bounds = array<i64: 2>, scalar_prefetch = 0 : i64, scratch_operands = 0 : i64, tpu.core_type = #tpu.core_type<tc>, window_params = [{transform_indices = @transform_0, window_bounds = array<i64: 1, 4, 64>}, {transform_indices = @transform_1, window_bounds = array<i64: 1, 4, 256>}, {pipeline_mode = #tpu.pipeline_mode<synchronous>, transform_indices = @transform_2, window_bounds = array<i64: 64, 256>}, {pipeline_mode = #tpu.pipeline_mode<synchronous>, transform_indices = @transform_3, window_bounds = array<i64: 9, 256>}, {pipeline_mode = #tpu.pipeline_mode<synchronous>, transform_indices = @transform_4, window_bounds = array<i64: 9, 8, 8>}, {pipeline_mode = #tpu.pipeline_mode<synchronous>, transform_indices = @transform_5, window_bounds = array<i64: 9, 8, 8>}, {pipeline_mode = #tpu.pipeline_mode<synchronous>, transform_indices = @transform_6, window_bounds = array<i64: 8, 2>}, {transform_indices = @transform_7, window_bounds = array<i64: 1, 8, 256>}]} {
    %c0 = arith.constant 0 : index
    %c0_0 = arith.constant 0 : index
    %0 = vector.load %arg4[%c0, %c0_0] : memref<9x256xf32, #tpu.memory_space<vmem>>, vector<9x256xf32>
    %c0_1 = arith.constant 0 : index
    %c0_2 = arith.constant 0 : index
    %c0_3 = arith.constant 0 : index
    %1 = vector.load %arg1[%c0_1, %c0_2, %c0_3] : memref<1x4x64xbf16, #tpu.memory_space<vmem>>, vector<1x4x64xbf16>
    %2 = vector.shape_cast %1 : vector<1x4x64xbf16> to vector<4x64xbf16>
    %c0_4 = arith.constant 0 : index
    %c0_5 = arith.constant 0 : index
    %3 = vector.load %arg3[%c0_4, %c0_5] : memref<64x256xbf16, #tpu.memory_space<vmem>>, vector<64x256xbf16>
    %cst = arith.constant dense<0.000000e+00> : vector<4x256xf32>
    %4 = tpu.matmul %2, %3, %cst {dimension_numbers = #tpu.dot_dimension_numbers<[1], [0], [0], [1], [0, 0, 1, 1], [], []>} : vector<4x64xbf16>, vector<64x256xbf16>, vector<4x256xf32> -> vector<4x256xf32>
    %c0_6 = arith.constant 0 : index
    %c0_7 = arith.constant 0 : index
    %c0_8 = arith.constant 0 : index
    %5 = vector.load %arg2[%c0_6, %c0_7, %c0_8] : memref<1x4x256xf32, #tpu.memory_space<vmem>>, vector<1x4x256xf32>
    %6 = vector.shape_cast %5 : vector<1x4x256xf32> to vector<4x256xf32>
    %7 = tpu.concatenate %4, %6 in 0 : vector<4x256xf32>, vector<4x256xf32> -> vector<8x256xf32>
    %c0_9 = arith.constant 0 : index
    %c0_10 = arith.constant 0 : index
    %8 = vector.load %arg7[%c0_9, %c0_10] : memref<8x2xf32, #tpu.memory_space<vmem>>, vector<8x2xf32>
    %9 = vector.extract_strided_slice %8 {offsets = [0, 0], sizes = [8, 1], strides = [1, 1]} : vector<8x2xf32> to vector<8x1xf32>
    %c17_i32 = arith.constant 17 : i32
    %10 = tpu.dynamic_rotate %7 by %c17_i32 dim 1 : vector<8x256xf32>, i32 -> vector<8x256xf32>
    %11 = vector.extract_strided_slice %0 {offsets = [0, 0], sizes = [1, 256], strides = [1, 1]} : vector<9x256xf32> to vector<1x256xf32>
    %12 = vector.broadcast %11 : vector<1x256xf32> to vector<8x256xf32>
    %13 = arith.mulf %10, %12 : vector<8x256xf32>
    %c0_11 = arith.constant 0 : index
    %c0_12 = arith.constant 0 : index
    %c0_13 = arith.constant 0 : index
    %14 = vector.load %arg5[%c0_11, %c0_12, %c0_13] : memref<9x8x8xbf16, #tpu.memory_space<vmem>>, vector<1x8x8xbf16>
    %15 = vector.shape_cast %14 : vector<1x8x8xbf16> to vector<8x8xbf16>
    %16 = arith.truncf %13 : vector<8x256xf32> to vector<8x256xbf16>
    %cst_14 = arith.constant dense<0.000000e+00> : vector<8x256xf32>
    %17 = tpu.matmul %15, %16, %cst_14 {dimension_numbers = #tpu.dot_dimension_numbers<[1], [0], [0], [1], [0, 0, 1, 1], [], []>} : vector<8x8xbf16>, vector<8x256xbf16>, vector<8x256xf32> -> vector<8x256xf32>
    %c16_i32 = arith.constant 16 : i32
    %18 = tpu.dynamic_rotate %7 by %c16_i32 dim 1 : vector<8x256xf32>, i32 -> vector<8x256xf32>
    %19 = vector.extract_strided_slice %0 {offsets = [1, 0], sizes = [1, 256], strides = [1, 1]} : vector<9x256xf32> to vector<1x256xf32>
    %20 = vector.broadcast %19 : vector<1x256xf32> to vector<8x256xf32>
    %21 = arith.mulf %18, %20 : vector<8x256xf32>
    %c1 = arith.constant 1 : index
    %c0_15 = arith.constant 0 : index
    %c0_16 = arith.constant 0 : index
    %22 = vector.load %arg5[%c1, %c0_15, %c0_16] : memref<9x8x8xbf16, #tpu.memory_space<vmem>>, vector<1x8x8xbf16>
    %23 = vector.shape_cast %22 : vector<1x8x8xbf16> to vector<8x8xbf16>
    %24 = arith.truncf %21 : vector<8x256xf32> to vector<8x256xbf16>
    %cst_17 = arith.constant dense<0.000000e+00> : vector<8x256xf32>
    %25 = tpu.matmul %23, %24, %cst_17 {dimension_numbers = #tpu.dot_dimension_numbers<[1], [0], [0], [1], [0, 0, 1, 1], [], []>} : vector<8x8xbf16>, vector<8x256xbf16>, vector<8x256xf32> -> vector<8x256xf32>
    %26 = arith.addf %17, %25 : vector<8x256xf32>
    %c15_i32 = arith.constant 15 : i32
    %27 = tpu.dynamic_rotate %7 by %c15_i32 dim 1 : vector<8x256xf32>, i32 -> vector<8x256xf32>
    %28 = vector.extract_strided_slice %0 {offsets = [2, 0], sizes = [1, 256], strides = [1, 1]} : vector<9x256xf32> to vector<1x256xf32>
    %29 = vector.broadcast %28 : vector<1x256xf32> to vector<8x256xf32>
    %30 = arith.mulf %27, %29 : vector<8x256xf32>
    %c2 = arith.constant 2 : index
    %c0_18 = arith.constant 0 : index
    %c0_19 = arith.constant 0 : index
    %31 = vector.load %arg5[%c2, %c0_18, %c0_19] : memref<9x8x8xbf16, #tpu.memory_space<vmem>>, vector<1x8x8xbf16>
    %32 = vector.shape_cast %31 : vector<1x8x8xbf16> to vector<8x8xbf16>
    %33 = arith.truncf %30 : vector<8x256xf32> to vector<8x256xbf16>
    %cst_20 = arith.constant dense<0.000000e+00> : vector<8x256xf32>
    %34 = tpu.matmul %32, %33, %cst_20 {dimension_numbers = #tpu.dot_dimension_numbers<[1], [0], [0], [1], [0, 0, 1, 1], [], []>} : vector<8x8xbf16>, vector<8x256xbf16>, vector<8x256xf32> -> vector<8x256xf32>
    %35 = arith.addf %26, %34 : vector<8x256xf32>
    %c1_i32 = arith.constant 1 : i32
    %36 = tpu.dynamic_rotate %7 by %c1_i32 dim 1 : vector<8x256xf32>, i32 -> vector<8x256xf32>
    %37 = vector.extract_strided_slice %0 {offsets = [3, 0], sizes = [1, 256], strides = [1, 1]} : vector<9x256xf32> to vector<1x256xf32>
    %38 = vector.broadcast %37 : vector<1x256xf32> to vector<8x256xf32>
    %39 = arith.mulf %36, %38 : vector<8x256xf32>
    %c3 = arith.constant 3 : index
    %c0_21 = arith.constant 0 : index
    %c0_22 = arith.constant 0 : index
    %40 = vector.load %arg5[%c3, %c0_21, %c0_22] : memref<9x8x8xbf16, #tpu.memory_space<vmem>>, vector<1x8x8xbf16>
    %41 = vector.shape_cast %40 : vector<1x8x8xbf16> to vector<8x8xbf16>
    %42 = arith.truncf %39 : vector<8x256xf32> to vector<8x256xbf16>
    %cst_23 = arith.constant dense<0.000000e+00> : vector<8x256xf32>
    %43 = tpu.matmul %41, %42, %cst_23 {dimension_numbers = #tpu.dot_dimension_numbers<[1], [0], [0], [1], [0, 0, 1, 1], [], []>} : vector<8x8xbf16>, vector<8x256xbf16>, vector<8x256xf32> -> vector<8x256xf32>
    %44 = arith.addf %35, %43 : vector<8x256xf32>
    %c4 = arith.constant 4 : index
    %c0_24 = arith.constant 0 : index
    %c0_25 = arith.constant 0 : index
    %45 = vector.load %arg5[%c4, %c0_24, %c0_25] : memref<9x8x8xbf16, #tpu.memory_space<vmem>>, vector<1x8x8xbf16>
    %46 = vector.shape_cast %45 : vector<1x8x8xbf16> to vector<8x8xbf16>
    %47 = arith.truncf %7 : vector<8x256xf32> to vector<8x256xbf16>
    %cst_26 = arith.constant dense<0.000000e+00> : vector<8x256xf32>
    %48 = tpu.matmul %46, %47, %cst_26 {dimension_numbers = #tpu.dot_dimension_numbers<[1], [0], [0], [1], [0, 0, 1, 1], [], []>} : vector<8x8xbf16>, vector<8x256xbf16>, vector<8x256xf32> -> vector<8x256xf32>
    %49 = arith.addf %44, %48 : vector<8x256xf32>
    %c255_i32 = arith.constant 255 : i32
    %50 = tpu.dynamic_rotate %7 by %c255_i32 dim 1 : vector<8x256xf32>, i32 -> vector<8x256xf32>
    %51 = vector.extract_strided_slice %0 {offsets = [5, 0], sizes = [1, 256], strides = [1, 1]} : vector<9x256xf32> to vector<1x256xf32>
    %52 = vector.broadcast %51 : vector<1x256xf32> to vector<8x256xf32>
    %53 = arith.mulf %50, %52 : vector<8x256xf32>
    %c5 = arith.constant 5 : index
    %c0_27 = arith.constant 0 : index
    %c0_28 = arith.constant 0 : index
    %54 = vector.load %arg5[%c5, %c0_27, %c0_28] : memref<9x8x8xbf16, #tpu.memory_space<vmem>>, vector<1x8x8xbf16>
    %55 = vector.shape_cast %54 : vector<1x8x8xbf16> to vector<8x8xbf16>
    %56 = arith.truncf %53 : vector<8x256xf32> to vector<8x256xbf16>
    %cst_29 = arith.constant dense<0.000000e+00> : vector<8x256xf32>
    %57 = tpu.matmul %55, %56, %cst_29 {dimension_numbers = #tpu.dot_dimension_numbers<[1], [0], [0], [1], [0, 0, 1, 1], [], []>} : vector<8x8xbf16>, vector<8x256xbf16>, vector<8x256xf32> -> vector<8x256xf32>
    %58 = arith.addf %49, %57 : vector<8x256xf32>
    %c241_i32 = arith.constant 241 : i32
    %59 = tpu.dynamic_rotate %7 by %c241_i32 dim 1 : vector<8x256xf32>, i32 -> vector<8x256xf32>
    %60 = vector.extract_strided_slice %0 {offsets = [6, 0], sizes = [1, 256], strides = [1, 1]} : vector<9x256xf32> to vector<1x256xf32>
    %61 = vector.broadcast %60 : vector<1x256xf32> to vector<8x256xf32>
    %62 = arith.mulf %59, %61 : vector<8x256xf32>
    %c6 = arith.constant 6 : index
    %c0_30 = arith.constant 0 : index
    %c0_31 = arith.constant 0 : index
    %63 = vector.load %arg5[%c6, %c0_30, %c0_31] : memref<9x8x8xbf16, #tpu.memory_space<vmem>>, vector<1x8x8xbf16>
    %64 = vector.shape_cast %63 : vector<1x8x8xbf16> to vector<8x8xbf16>
    %65 = arith.truncf %62 : vector<8x256xf32> to vector<8x256xbf16>
    %cst_32 = arith.constant dense<0.000000e+00> : vector<8x256xf32>
    %66 = tpu.matmul %64, %65, %cst_32 {dimension_numbers = #tpu.dot_dimension_numbers<[1], [0], [0], [1], [0, 0, 1, 1], [], []>} : vector<8x8xbf16>, vector<8x256xbf16>, vector<8x256xf32> -> vector<8x256xf32>
    %67 = arith.addf %58, %66 : vector<8x256xf32>
    %c240_i32 = arith.constant 240 : i32
    %68 = tpu.dynamic_rotate %7 by %c240_i32 dim 1 : vector<8x256xf32>, i32 -> vector<8x256xf32>
    %69 = vector.extract_strided_slice %0 {offsets = [7, 0], sizes = [1, 256], strides = [1, 1]} : vector<9x256xf32> to vector<1x256xf32>
    %70 = vector.broadcast %69 : vector<1x256xf32> to vector<8x256xf32>
    %71 = arith.mulf %68, %70 : vector<8x256xf32>
    %c7 = arith.constant 7 : index
    %c0_33 = arith.constant 0 : index
    %c0_34 = arith.constant 0 : index
    %72 = vector.load %arg5[%c7, %c0_33, %c0_34] : memref<9x8x8xbf16, #tpu.memory_space<vmem>>, vector<1x8x8xbf16>
    %73 = vector.shape_cast %72 : vector<1x8x8xbf16> to vector<8x8xbf16>
    %74 = arith.truncf %71 : vector<8x256xf32> to vector<8x256xbf16>
    %cst_35 = arith.constant dense<0.000000e+00> : vector<8x256xf32>
    %75 = tpu.matmul %73, %74, %cst_35 {dimension_numbers = #tpu.dot_dimension_numbers<[1], [0], [0], [1], [0, 0, 1, 1], [], []>} : vector<8x8xbf16>, vector<8x256xbf16>, vector<8x256xf32> -> vector<8x256xf32>
    %76 = arith.addf %67, %75 : vector<8x256xf32>
    %c239_i32 = arith.constant 239 : i32
    %77 = tpu.dynamic_rotate %7 by %c239_i32 dim 1 : vector<8x256xf32>, i32 -> vector<8x256xf32>
    %78 = vector.extract_strided_slice %0 {offsets = [8, 0], sizes = [1, 256], strides = [1, 1]} : vector<9x256xf32> to vector<1x256xf32>
    %79 = vector.broadcast %78 : vector<1x256xf32> to vector<8x256xf32>
    %80 = arith.mulf %77, %79 : vector<8x256xf32>
    %c8 = arith.constant 8 : index
    %c0_36 = arith.constant 0 : index
    %c0_37 = arith.constant 0 : index
    %81 = vector.load %arg5[%c8, %c0_36, %c0_37] : memref<9x8x8xbf16, #tpu.memory_space<vmem>>, vector<1x8x8xbf16>
    %82 = vector.shape_cast %81 : vector<1x8x8xbf16> to vector<8x8xbf16>
    %83 = arith.truncf %80 : vector<8x256xf32> to vector<8x256xbf16>
    %cst_38 = arith.constant dense<0.000000e+00> : vector<8x256xf32>
    %84 = tpu.matmul %82, %83, %cst_38 {dimension_numbers = #tpu.dot_dimension_numbers<[1], [0], [0], [1], [0, 0, 1, 1], [], []>} : vector<8x8xbf16>, vector<8x256xbf16>, vector<8x256xf32> -> vector<8x256xf32>
    %85 = arith.addf %76, %84 : vector<8x256xf32>
    %86 = vector.broadcast %9 : vector<8x1xf32> to vector<8x256xf32>
    %87 = arith.addf %85, %86 : vector<8x256xf32>
    %cst_39 = arith.constant 0.000000e+00 : f32
    %88 = vector.broadcast %cst_39 : f32 to vector<8x256xf32>
    %89 = arith.cmpf oge, %87, %88 : vector<8x256xf32>
    %cst_40 = arith.constant 0.00999999977 : f32
    %90 = vector.broadcast %cst_40 : f32 to vector<8x256xf32>
    %91 = arith.mulf %90, %87 : vector<8x256xf32>
    %92 = arith.select %89, %87, %91 : vector<8x256xi1>, vector<8x256xf32>
    %93 = vector.extract_strided_slice %8 {offsets = [0, 1], sizes = [8, 1], strides = [1, 1]} : vector<8x2xf32> to vector<8x1xf32>
    %c17_i32_41 = arith.constant 17 : i32
    %94 = tpu.dynamic_rotate %92 by %c17_i32_41 dim 1 : vector<8x256xf32>, i32 -> vector<8x256xf32>
    %95 = vector.extract_strided_slice %0 {offsets = [0, 0], sizes = [1, 256], strides = [1, 1]} : vector<9x256xf32> to vector<1x256xf32>
    %96 = vector.broadcast %95 : vector<1x256xf32> to vector<8x256xf32>
    %97 = arith.mulf %94, %96 : vector<8x256xf32>
    %c0_42 = arith.constant 0 : index
    %c0_43 = arith.constant 0 : index
    %c0_44 = arith.constant 0 : index
    %98 = vector.load %arg6[%c0_42, %c0_43, %c0_44] : memref<9x8x8xbf16, #tpu.memory_space<vmem>>, vector<1x8x8xbf16>
    %99 = vector.shape_cast %98 : vector<1x8x8xbf16> to vector<8x8xbf16>
    %100 = arith.truncf %97 : vector<8x256xf32> to vector<8x256xbf16>
    %cst_45 = arith.constant dense<0.000000e+00> : vector<8x256xf32>
    %101 = tpu.matmul %99, %100, %cst_45 {dimension_numbers = #tpu.dot_dimension_numbers<[1], [0], [0], [1], [0, 0, 1, 1], [], []>} : vector<8x8xbf16>, vector<8x256xbf16>, vector<8x256xf32> -> vector<8x256xf32>
    %c16_i32_46 = arith.constant 16 : i32
    %102 = tpu.dynamic_rotate %92 by %c16_i32_46 dim 1 : vector<8x256xf32>, i32 -> vector<8x256xf32>
    %103 = vector.extract_strided_slice %0 {offsets = [1, 0], sizes = [1, 256], strides = [1, 1]} : vector<9x256xf32> to vector<1x256xf32>
    %104 = vector.broadcast %103 : vector<1x256xf32> to vector<8x256xf32>
    %105 = arith.mulf %102, %104 : vector<8x256xf32>
    %c1_47 = arith.constant 1 : index
    %c0_48 = arith.constant 0 : index
    %c0_49 = arith.constant 0 : index
    %106 = vector.load %arg6[%c1_47, %c0_48, %c0_49] : memref<9x8x8xbf16, #tpu.memory_space<vmem>>, vector<1x8x8xbf16>
    %107 = vector.shape_cast %106 : vector<1x8x8xbf16> to vector<8x8xbf16>
    %108 = arith.truncf %105 : vector<8x256xf32> to vector<8x256xbf16>
    %cst_50 = arith.constant dense<0.000000e+00> : vector<8x256xf32>
    %109 = tpu.matmul %107, %108, %cst_50 {dimension_numbers = #tpu.dot_dimension_numbers<[1], [0], [0], [1], [0, 0, 1, 1], [], []>} : vector<8x8xbf16>, vector<8x256xbf16>, vector<8x256xf32> -> vector<8x256xf32>
    %110 = arith.addf %101, %109 : vector<8x256xf32>
    %c15_i32_51 = arith.constant 15 : i32
    %111 = tpu.dynamic_rotate %92 by %c15_i32_51 dim 1 : vector<8x256xf32>, i32 -> vector<8x256xf32>
    %112 = vector.extract_strided_slice %0 {offsets = [2, 0], sizes = [1, 256], strides = [1, 1]} : vector<9x256xf32> to vector<1x256xf32>
    %113 = vector.broadcast %112 : vector<1x256xf32> to vector<8x256xf32>
    %114 = arith.mulf %111, %113 : vector<8x256xf32>
    %c2_52 = arith.constant 2 : index
    %c0_53 = arith.constant 0 : index
    %c0_54 = arith.constant 0 : index
    %115 = vector.load %arg6[%c2_52, %c0_53, %c0_54] : memref<9x8x8xbf16, #tpu.memory_space<vmem>>, vector<1x8x8xbf16>
    %116 = vector.shape_cast %115 : vector<1x8x8xbf16> to vector<8x8xbf16>
    %117 = arith.truncf %114 : vector<8x256xf32> to vector<8x256xbf16>
    %cst_55 = arith.constant dense<0.000000e+00> : vector<8x256xf32>
    %118 = tpu.matmul %116, %117, %cst_55 {dimension_numbers = #tpu.dot_dimension_numbers<[1], [0], [0], [1], [0, 0, 1, 1], [], []>} : vector<8x8xbf16>, vector<8x256xbf16>, vector<8x256xf32> -> vector<8x256xf32>
    %119 = arith.addf %110, %118 : vector<8x256xf32>
    %c1_i32_56 = arith.constant 1 : i32
    %120 = tpu.dynamic_rotate %92 by %c1_i32_56 dim 1 : vector<8x256xf32>, i32 -> vector<8x256xf32>
    %121 = vector.extract_strided_slice %0 {offsets = [3, 0], sizes = [1, 256], strides = [1, 1]} : vector<9x256xf32> to vector<1x256xf32>
    %122 = vector.broadcast %121 : vector<1x256xf32> to vector<8x256xf32>
    %123 = arith.mulf %120, %122 : vector<8x256xf32>
    %c3_57 = arith.constant 3 : index
    %c0_58 = arith.constant 0 : index
    %c0_59 = arith.constant 0 : index
    %124 = vector.load %arg6[%c3_57, %c0_58, %c0_59] : memref<9x8x8xbf16, #tpu.memory_space<vmem>>, vector<1x8x8xbf16>
    %125 = vector.shape_cast %124 : vector<1x8x8xbf16> to vector<8x8xbf16>
    %126 = arith.truncf %123 : vector<8x256xf32> to vector<8x256xbf16>
    %cst_60 = arith.constant dense<0.000000e+00> : vector<8x256xf32>
    %127 = tpu.matmul %125, %126, %cst_60 {dimension_numbers = #tpu.dot_dimension_numbers<[1], [0], [0], [1], [0, 0, 1, 1], [], []>} : vector<8x8xbf16>, vector<8x256xbf16>, vector<8x256xf32> -> vector<8x256xf32>
    %128 = arith.addf %119, %127 : vector<8x256xf32>
    %c4_61 = arith.constant 4 : index
    %c0_62 = arith.constant 0 : index
    %c0_63 = arith.constant 0 : index
    %129 = vector.load %arg6[%c4_61, %c0_62, %c0_63] : memref<9x8x8xbf16, #tpu.memory_space<vmem>>, vector<1x8x8xbf16>
    %130 = vector.shape_cast %129 : vector<1x8x8xbf16> to vector<8x8xbf16>
    %131 = arith.truncf %92 : vector<8x256xf32> to vector<8x256xbf16>
    %cst_64 = arith.constant dense<0.000000e+00> : vector<8x256xf32>
    %132 = tpu.matmul %130, %131, %cst_64 {dimension_numbers = #tpu.dot_dimension_numbers<[1], [0], [0], [1], [0, 0, 1, 1], [], []>} : vector<8x8xbf16>, vector<8x256xbf16>, vector<8x256xf32> -> vector<8x256xf32>
    %133 = arith.addf %128, %132 : vector<8x256xf32>
    %c255_i32_65 = arith.constant 255 : i32
    %134 = tpu.dynamic_rotate %92 by %c255_i32_65 dim 1 : vector<8x256xf32>, i32 -> vector<8x256xf32>
    %135 = vector.extract_strided_slice %0 {offsets = [5, 0], sizes = [1, 256], strides = [1, 1]} : vector<9x256xf32> to vector<1x256xf32>
    %136 = vector.broadcast %135 : vector<1x256xf32> to vector<8x256xf32>
    %137 = arith.mulf %134, %136 : vector<8x256xf32>
    %c5_66 = arith.constant 5 : index
    %c0_67 = arith.constant 0 : index
    %c0_68 = arith.constant 0 : index
    %138 = vector.load %arg6[%c5_66, %c0_67, %c0_68] : memref<9x8x8xbf16, #tpu.memory_space<vmem>>, vector<1x8x8xbf16>
    %139 = vector.shape_cast %138 : vector<1x8x8xbf16> to vector<8x8xbf16>
    %140 = arith.truncf %137 : vector<8x256xf32> to vector<8x256xbf16>
    %cst_69 = arith.constant dense<0.000000e+00> : vector<8x256xf32>
    %141 = tpu.matmul %139, %140, %cst_69 {dimension_numbers = #tpu.dot_dimension_numbers<[1], [0], [0], [1], [0, 0, 1, 1], [], []>} : vector<8x8xbf16>, vector<8x256xbf16>, vector<8x256xf32> -> vector<8x256xf32>
    %142 = arith.addf %133, %141 : vector<8x256xf32>
    %c241_i32_70 = arith.constant 241 : i32
    %143 = tpu.dynamic_rotate %92 by %c241_i32_70 dim 1 : vector<8x256xf32>, i32 -> vector<8x256xf32>
    %144 = vector.extract_strided_slice %0 {offsets = [6, 0], sizes = [1, 256], strides = [1, 1]} : vector<9x256xf32> to vector<1x256xf32>
    %145 = vector.broadcast %144 : vector<1x256xf32> to vector<8x256xf32>
    %146 = arith.mulf %143, %145 : vector<8x256xf32>
    %c6_71 = arith.constant 6 : index
    %c0_72 = arith.constant 0 : index
    %c0_73 = arith.constant 0 : index
    %147 = vector.load %arg6[%c6_71, %c0_72, %c0_73] : memref<9x8x8xbf16, #tpu.memory_space<vmem>>, vector<1x8x8xbf16>
    %148 = vector.shape_cast %147 : vector<1x8x8xbf16> to vector<8x8xbf16>
    %149 = arith.truncf %146 : vector<8x256xf32> to vector<8x256xbf16>
    %cst_74 = arith.constant dense<0.000000e+00> : vector<8x256xf32>
    %150 = tpu.matmul %148, %149, %cst_74 {dimension_numbers = #tpu.dot_dimension_numbers<[1], [0], [0], [1], [0, 0, 1, 1], [], []>} : vector<8x8xbf16>, vector<8x256xbf16>, vector<8x256xf32> -> vector<8x256xf32>
    %151 = arith.addf %142, %150 : vector<8x256xf32>
    %c240_i32_75 = arith.constant 240 : i32
    %152 = tpu.dynamic_rotate %92 by %c240_i32_75 dim 1 : vector<8x256xf32>, i32 -> vector<8x256xf32>
    %153 = vector.extract_strided_slice %0 {offsets = [7, 0], sizes = [1, 256], strides = [1, 1]} : vector<9x256xf32> to vector<1x256xf32>
    %154 = vector.broadcast %153 : vector<1x256xf32> to vector<8x256xf32>
    %155 = arith.mulf %152, %154 : vector<8x256xf32>
    %c7_76 = arith.constant 7 : index
    %c0_77 = arith.constant 0 : index
    %c0_78 = arith.constant 0 : index
    %156 = vector.load %arg6[%c7_76, %c0_77, %c0_78] : memref<9x8x8xbf16, #tpu.memory_space<vmem>>, vector<1x8x8xbf16>
    %157 = vector.shape_cast %156 : vector<1x8x8xbf16> to vector<8x8xbf16>
    %158 = arith.truncf %155 : vector<8x256xf32> to vector<8x256xbf16>
    %cst_79 = arith.constant dense<0.000000e+00> : vector<8x256xf32>
    %159 = tpu.matmul %157, %158, %cst_79 {dimension_numbers = #tpu.dot_dimension_numbers<[1], [0], [0], [1], [0, 0, 1, 1], [], []>} : vector<8x8xbf16>, vector<8x256xbf16>, vector<8x256xf32> -> vector<8x256xf32>
    %160 = arith.addf %151, %159 : vector<8x256xf32>
    %c239_i32_80 = arith.constant 239 : i32
    %161 = tpu.dynamic_rotate %92 by %c239_i32_80 dim 1 : vector<8x256xf32>, i32 -> vector<8x256xf32>
    %162 = vector.extract_strided_slice %0 {offsets = [8, 0], sizes = [1, 256], strides = [1, 1]} : vector<9x256xf32> to vector<1x256xf32>
    %163 = vector.broadcast %162 : vector<1x256xf32> to vector<8x256xf32>
    %164 = arith.mulf %161, %163 : vector<8x256xf32>
    %c8_81 = arith.constant 8 : index
    %c0_82 = arith.constant 0 : index
    %c0_83 = arith.constant 0 : index
    %165 = vector.load %arg6[%c8_81, %c0_82, %c0_83] : memref<9x8x8xbf16, #tpu.memory_space<vmem>>, vector<1x8x8xbf16>
    %166 = vector.shape_cast %165 : vector<1x8x8xbf16> to vector<8x8xbf16>
    %167 = arith.truncf %164 : vector<8x256xf32> to vector<8x256xbf16>
    %cst_84 = arith.constant dense<0.000000e+00> : vector<8x256xf32>
    %168 = tpu.matmul %166, %167, %cst_84 {dimension_numbers = #tpu.dot_dimension_numbers<[1], [0], [0], [1], [0, 0, 1, 1], [], []>} : vector<8x8xbf16>, vector<8x256xbf16>, vector<8x256xf32> -> vector<8x256xf32>
    %169 = arith.addf %160, %168 : vector<8x256xf32>
    %170 = vector.broadcast %93 : vector<8x1xf32> to vector<8x256xf32>
    %171 = arith.addf %169, %170 : vector<8x256xf32>
    %cst_85 = arith.constant 0.000000e+00 : f32
    %172 = vector.broadcast %cst_85 : f32 to vector<8x256xf32>
    %173 = arith.cmpf oge, %171, %172 : vector<8x256xf32>
    %cst_86 = arith.constant 0.00999999977 : f32
    %174 = vector.broadcast %cst_86 : f32 to vector<8x256xf32>
    %175 = arith.mulf %174, %171 : vector<8x256xf32>
    %176 = arith.select %173, %171, %175 : vector<8x256xi1>, vector<8x256xf32>
    %c0_87 = arith.constant 0 : index
    %c0_88 = arith.constant 0 : index
    %c0_89 = arith.constant 0 : index
    %177 = vector.load %arg8[%c0_87, %c0_88, %c0_89] : memref<1x8x256xf32, #tpu.memory_space<vmem>>, vector<1x8x256xf32>
    %178 = vector.shape_cast %177 : vector<1x8x256xf32> to vector<8x256xf32>
    %179 = vector.shape_cast %176 : vector<8x256xf32> to vector<1x8x256xf32>
    tpu.vector_store %arg8[%c0_87, %c0_88, %c0_89], %179 {strides = array<i32>} : memref<1x8x256xf32, #tpu.memory_space<vmem>>, vector<1x8x256xf32>,
    return
  }
  func.func @transform_0(%arg0: i32) -> (i32, i32, i32) {
    %c0_i32 = arith.constant 0 : i32
    %c0_i32_0 = arith.constant 0 : i32
    %c0_i32_1 = arith.constant 0 : i32
    return %arg0, %c0_i32, %c0_i32_0 : i32, i32, i32
  }
  func.func @transform_1(%arg0: i32) -> (i32, i32, i32) {
    %c0_i32 = arith.constant 0 : i32
    %c0_i32_0 = arith.constant 0 : i32
    %c0_i32_1 = arith.constant 0 : i32
    return %arg0, %c0_i32, %c0_i32_0 : i32, i32, i32
  }
  func.func @transform_2(%arg0: i32) -> (i32, i32) {
    %c0_i32 = arith.constant 0 : i32
    %c0_i32_0 = arith.constant 0 : i32
    %c0_i32_1 = arith.constant 0 : i32
    return %c0_i32, %c0_i32_0 : i32, i32
  }
  func.func @transform_3(%arg0: i32) -> (i32, i32) {
    %c0_i32 = arith.constant 0 : i32
    %c0_i32_0 = arith.constant 0 : i32
    %c0_i32_1 = arith.constant 0 : i32
    return %c0_i32, %c0_i32_0 : i32, i32
  }
  func.func @transform_4(%arg0: i32) -> (i32, i32, i32) {
    %c0_i32 = arith.constant 0 : i32
    %c0_i32_0 = arith.constant 0 : i32
    %c0_i32_1 = arith.constant 0 : i32
    %c0_i32_2 = arith.constant 0 : i32
    return %c0_i32, %c0_i32_0, %c0_i32_1 : i32, i32, i32
  }
  func.func @transform_5(%arg0: i32) -> (i32, i32, i32) {
    %c0_i32 = arith.constant 0 : i32
    %c0_i32_0 = arith.constant 0 : i32
    %c0_i32_1 = arith.constant 0 : i32
    %c0_i32_2 = arith.constant 0 : i32
    return %c0_i32, %c0_i32_0, %c0_i32_1 : i32, i32, i32
  }
  func.func @transform_6(%arg0: i32) -> (i32, i32) {
    %c0_i32 = arith.constant 0 : i32
    %c0_i32_0 = arith.constant 0 : i32
    %c0_i32_1 = arith.constant 0 : i32
    return %c0_i32, %c0_i32_0 : i32, i32
  }
  func.func @transform_7(%arg0: i32) -> (i32, i32, i32) {
    %c0_i32 = arith.constant 0 : i32
    %c0_i32_0 = arith.constant 0 : i32
    %c0_i32_1 = arith.constant 0 : i32
    return %arg0, %c0_i32, %c0_i32_0 : i32, i32, i32
  }
}

</mosaic_0001>

<bundles_post_ra>
// kernel: upsample_forward.1
= control target key start
LH: loop header
LB: loop body
LE: loop exit
PB: predicated region body
PF: predicated region fallthrough
CT: control target
= control target key end

     0   :  { %s1866_s24 = smov 0   ;;  %s2309_s0 = inlined_call_operand.vmem [shape: bf16[2,4,64], index: 0, kind: input, shape index: {}]   ;;  %s2310_s1 = inlined_call_operand.vmem [shape: f32[2,4,256], index: 1, kind: input, shape index: {}]   ;;  %s2311_s2 = inlined_call_operand.vmem [shape: bf16[64,256], index: 2, kind: input, shape index: {}]   ;;  %s2312_s3 = inlined_call_operand.vmem [shape: f32[9,256], index: 3, kind: input, shape index: {}]   ;;  %s2313_s4 = inlined_call_operand.vmem [shape: bf16[9,8,8], index: 4, kind: input, shape index: {}]   ;;  %s2314_s5 = inlined_call_operand.vmem [shape: bf16[9,8,8], index: 5, kind: input, shape index: {}]   ;;  %s2315_s6 = inlined_call_operand.vmem [shape: f32[8,2], index: 6, kind: input, shape index: {}]   ;;  %s2316_s7 = inlined_call_operand.vmem [shape: f32[2,8,256], index: 7, kind: output, shape index: {}]  }
   0x1 LB: > { %s1698_s25 = sadd.s32 4294967295, %s1814_s24   ;;  %p1702_p0 = scmp.ge.s32.totalorder %s1814_s24, 1  ;;  %s1814_s24 = sphi %s1866_s24, %s17_s24  }
   0x2   : > { %p246_p1 = scmp.lt.s32.totalorder %s1814_s24, 3 }
   0x4   : > { %p247_p2 = pnand %p1702_p0, %p246_p1 }
   0x5   : > { %v1795_v0 = vld [vmem:[%s2311_s2 + $0x4] ss:$8 sps:$4 sm:$0xff] (!%p247_p2)   ;;  %v1797_v1 = vld [vmem:[%s2311_s2] ss:$8 sps:$4 sm:$0xff] (!%p247_p2)   ;;  %v1816_v2 = vmov (!%p247_p2), 0   ;;  %p282_p3 = scmp.lt.s32.totalorder (!%p247_p2), %s1698_s25, 1  ;;  %v407_v19 = vlaneseq (!%p247_p2) }
   0x6   : > { %250 = sbr.rel (%p247_p2) target bundleno = 1004 (0x3ec), region = 48  ;;  %386 = vmatprep.mubr.bf16.mxu0 (!%p247_p2), %v1816_v2  ;;  %488 = vmatprep.mubr.bf16.mxu1 (!%p247_p2), %v1816_v2  ;;  %v1798_v3 = vld [vmem:[%s2311_s2 + $0x14] ss:$8 sps:$4 sm:$0xff] (!%p247_p2)   ;;  %v1800_v4 = vld [vmem:[%s2311_s2 + $0x10] ss:$8 sps:$4 sm:$0xff] (!%p247_p2)   ;;  %vm350_vm0 = vcmask (!%p247_p2), 523264  }
   0x7   : > { %354 = vmatprep.subr.bf16.mxu0 (!%p247_p2), %v1795_v0  ;;  %1793 = vset.pattern.permute.xlu0 (!%p247_p2), %v1816_v2  ;;  %v1801_v5 = vld [vmem:[%s2311_s2 + $0x24] ss:$8 sps:$4 sm:$0xff] (!%p247_p2)   ;;  %v1803_v6 = vld [vmem:[%s2311_s2 + $0x20] ss:$8 sps:$4 sm:$0xff] (!%p247_p2)   ;;  %v1804_v7 = vld [vmem:[%s2311_s2 + $0x34] ss:$8 sps:$4 sm:$0xff] (!%p247_p2)  }
   0x8   : > { %355 = vmatpush1.bf16.msra.mxu0 (!%p247_p2), %v1797_v1  ;;  %v1806_v8 = vld [vmem:[%s2311_s2 + $0x30] ss:$8 sps:$4 sm:$0xff] (!%p247_p2)   ;;  %vm399_vm1 = vcmask (!%p247_p2), 1043456   ;;  %s1817_s29 = smov (!%p247_p2), 17   ;;  %s1818_s30 = smov (!%p247_p2), 16   ;;  %v1953_v18 = vld [vmem:[%s2315_s6] sm:$0xff] (!%p247_p2) }
   0x9   : > { %356 = vmatprep.subr.bf16.mxu0 (!%p247_p2), %v1798_v3  ;;  %s1819_s8 = smov (!%p247_p2), 15   ;;  %s1820_s9 = smov (!%p247_p2), 1   ;;  %v1956_v20 = vshrl.u32 (!%p247_p2), %v407_v19, 7  ;;  %v1958_v21 = vand.u32 (!%p247_p2), 127, %v407_v19  ;;  %v1964_v23 = vld [vmem:[%s2312_s3] sm:$0xff] (!%p247_p2)  ;;  %v1970_v25 = vld [vmem:[%s2312_s3 + $0x8] sm:$0xff] (!%p247_p2) }
   0xa   : > { %s1821_s10 = smov (!%p247_p2), 127   ;;  %s1822_s11 = smov (!%p247_p2), 113   ;;  %v1717_v59 = vld [vmem:[%s2313_s4 + $0x4] sm:$0xf] (!%p247_p2)  ;;  %vm446_vm6 = vcmask (!%p247_p2), 64512  }
   0xb   : > { %s1823_s12 = smov (!%p247_p2), 112   ;;  %s1824_s13 = smov (!%p247_p2), 111   ;;  %v414_v22 = vsub.s32 (!%p247_p2), 0, %v1956_v20  ;;  %v434_v24 = vsub.s32 (!%p247_p2), 1, %v1956_v20  ;;  %v556_v28 = vsub.s32 (!%p247_p2), 2, %v1956_v20  ;;  %vm409_vm2 = vcmp.lt.s32.totalorder (!%p247_p2), %v1958_v21, 17 }
   0xc   : > { %357 = vmatpush1.bf16.msra.mxu0 (!%p247_p2), %v1800_v4  ;;  %vm429_vm3 = vcmp.lt.s32.totalorder (!%p247_p2), %v1958_v21, 16  ;;  %vm551_vm4 = vcmp.lt.s32.totalorder (!%p247_p2), %v1958_v21, 15  ;;  %v629_v36 = vsub.s32 (!%p247_p2), 3, %v1956_v20  ;;  %vm624_vm5 = vcmp.lt.s32.totalorder (!%p247_p2), %v1958_v21, 1 }
   0xd   : > { %s2318_s25 = smov (!%p282_p3, %s1698_s25), 1  ;;  %358 = vmatprep.subr.bf16.mxu0 %v1801_v5  ;;  %v1975_v29 = vrot.slane %v1964_v23, %v414_v22  ;;  %v1978_v30 = vrot.slane %v1970_v25, %v414_v22  ;;  %v1982_v31 = vrot.slane %v1964_v23, %v434_v24  ;;  %v1985_v32 = vrot.slane %v1970_v25, %v434_v24 }
   0xe   : > { %s1703_s17 = sshll.u32 %s2318_s25, 1  ;;  %s1773_s23 = sshll.u32 %s2318_s25, 3  ;;  %v1989_v35 = vrot.slane %v1970_v25, %v556_v28  ;;  %v2005_v45 = vrot.slane %v1964_v23, %v556_v28  ;;  %v758_v50 = vsub.s32 5, %v1956_v20  ;;  %v2012_v53 = vrot.slane %v1964_v23, %v629_v36 }
   0xf   : > { %s285_s22 = scalar_lea.vmem %s2309_s0, %s1703_s17  ;;  %s290_s28 = scalar_lea.vmem %s2310_s1, %s1773_s23  ;;  %v2015_v54 = vrot.slane %v1970_v25, %v629_v36  ;;  %vm753_vm7 = vcmp.lt.s32.totalorder %v1958_v21, 127  ;;  %vm826_vm8 = vcmp.lt.s32.totalorder %v1958_v21, 113  ;;  %v1725_v36 = vld [vmem:[%s2313_s4 + $0xc] sm:$0xf]  ;;  %vm899_vm9 = vcmp.lt.s32.totalorder %v1958_v21, 112 }
  0x10   : > { %359 = vmatpush1.bf16.msra.mxu0 %v1803_v6  ;;  %v301_v9 = vld [vmem:[%s285_s22] sm:$0x3]  ;;  %v2028_v62 = vrot.slane %v1964_v23, %v758_v50  ;;  %v2036_v3 = vrot.slane %v1970_v25, %v758_v50  ;;  %vm972_vm10 = vcmp.lt.s32.totalorder %v1958_v21, 111 }
  0x11   : > { %360 = vmatprep.subr.bf16.mxu0 %v1804_v7  ;;  %v395_v10 = vld [vmem:[%s290_s28] sm:$0xff]  ;;  %s1774_s28 = sshll.u32 %s2318_s25, 4 }
  0x12   : > { %v397_v11 = vcombine.low %v395_v10, %v395_v10 }
  0x14   : > { %361 = vmatpush1.bf16.msra.mxu0 %v1806_v8 }
  0x17   : > { %1716 = vmatmul.mubr.msk.bf16.vlgmr.msra.gmra.mrb[0].mxu0 %vm350_vm0, %v301_v9 }
  0x18   : > { %682 = vmatprep.mubr.bf16.mxu0 %v1816_v2 }
  0xea   : > { %v388_v12 = vpop.f32.mrb[0].mxu0 }
  0xeb   : > { %v1913_v13 = vsel %vm399_vm1, %v388_v12, %v397_v11  ;;  %v390_v14 = vpop.f32.mrb[1].mxu0 }
  0xec   : > { %403 = vrot.lane.b32.xlu1 %v1913_v13, %s1817_s29  ;;  %425 = vrot.lane.b32.xlu0 %v1913_v13, %s1818_s30  ;;  %v392_v15 = vpop.f32.mrb[2].mxu0  ;;  %v1920_v17 = vsel %vm399_vm1, %v390_v14, %v395_v10 }
  0xed   : > { %v393_v16 = vpop.f32.mrb[3].mxu0  ;;  %v831_v15 = vsub.s32 6, %v1956_v20 }
  0xee   : > { %v904_v16 = vsub.s32 7, %v1956_v20 }
  0xf0   : > { %405 = vrot.lane.b32.xlu1 %v1920_v17, %s1817_s29  ;;  %427 = vrot.lane.b32.xlu0 %v1920_v17, %s1818_s30 }
  0xf4   : > { %549 = vrot.lane.b32.xlu1 %v1920_v17, %s1819_s8  ;;  %547 = vrot.lane.b32.xlu0 %v1913_v13, %s1819_s8 }
  0xf8   : > { %622 = vrot.lane.b32.xlu1 %v1920_v17, %s1820_s9  ;;  %620 = vrot.lane.b32.xlu0 %v1913_v13, %s1820_s9 }
  0xfc   : > { %751 = vrot.lane.b32.xlu1 %v1920_v17, %s1821_s10  ;;  %749 = vrot.lane.b32.xlu0 %v1913_v13, %s1821_s10 }
 0x100   : > { %824 = vrot.lane.b32.xlu1 %v1920_v17, %s1822_s11  ;;  %822 = vrot.lane.b32.xlu0 %v1913_v13, %s1822_s11 }
 0x104   : > { %897 = vrot.lane.b32.xlu1 %v1920_v17, %s1823_s12  ;;  %895 = vrot.lane.b32.xlu0 %v1913_v13, %s1823_s12 }
 0x108   : > { %970 = vrot.lane.b32.xlu1 %v1920_v17, %s1824_s13  ;;  %968 = vrot.lane.b32.xlu0 %v1913_v13, %s1824_s13 }
 0x10c   : > { %1043 = vperm.xlu0 %1793, %v1953_v18  }
 0x15e   : > { %v404_v26 = vpop.permute.xlu1 %403  ;;  %v426_v27 = vpop.permute.xlu0 %425 }
 0x162   : > { %v406_v33 = vpop.permute.xlu1 %405  ;;  %v428_v34 = vpop.permute.xlu0 %427 }
 0x163   : > { %v410_v37 = vsel %vm409_vm2, %v404_v26, %v406_v33  ;;  %v411_v38 = vsel %vm409_vm2, %v406_v33, %v404_v26  ;;  %v430_v39 = vsel %vm429_vm3, %v426_v27, %v428_v34  ;;  %v431_v40 = vsel %vm429_vm3, %v428_v34, %v426_v27  ;;  %v422_v27 = vld [vmem:[%s2313_s4] sm:$0xf] }
 0x164   : > { %v420_v41 = vmul.f32 %v1975_v29, %v411_v38  ;;  %v421_v42 = vmul.f32 %v1978_v30, %v410_v37  ;;  %v440_v43 = vmul.f32 %v1982_v31, %v431_v40  ;;  %v441_v44 = vmul.f32 %v1985_v32, %v430_v39 }
 0x165   : > { %v2062_v37 = vrot.slane %v1970_v25, %v831_v15  ;;  %v696_v38 = vpack.c.bf16 %v1920_v17, %v1920_v17 }
 0x166   : > { %v550_v46 = vpop.permute.xlu1 %549  ;;  %v548_v47 = vpop.permute.xlu0 %547  ;;  %v445_v48 = vpack.c.bf16 %v441_v44, %v441_v44  ;;  %v444_v49 = vpack.c.bf16 %v440_v43, %v440_v43  ;;  %v423_v51 = vpack.c.bf16 %v420_v41, %v420_v41  ;;  %v424_v55 = vpack.c.bf16 %v421_v42, %v421_v42 }
 0x167   : > { %v552_v52 = vsel %vm551_vm4, %v548_v47, %v550_v46  ;;  %v553_v56 = vsel %vm551_vm4, %v550_v46, %v548_v47  ;;  %v2072_v41 = vrot.slane %v1964_v23, %v904_v16  ;;  %v2075_v42 = vrot.slane %v1970_v25, %v904_v16 }
 0x168   : > { %v563_v57 = vmul.f32 %v1989_v35, %v552_v52  ;;  %1718 = vmatprep.subr.msk.bf16.mxu1 %vm399_vm1, %v445_v48  ;;  %v451_v58 = vsel %vm399_vm1, %v444_v49, 0  ;;  %v562_v63 = vmul.f32 %v2005_v45, %v553_v56  ;;  %v501_v7 = vsel %vm399_vm1, %v423_v51, 0 }
 0x169   : > { %457 = vmatpush1.bf16.msra.mxu1 %v451_v58  ;;  %v695_v25 = vpack.c.bf16 %v1913_v13, %v1913_v13  ;;  %v2090_v48 = vrot.slane %v1964_v23, %v831_v15  ;;  %v1731_v58 = vld [vmem:[%s2313_s4 + $0x14] sm:$0xf]  ;;  %v1734_v15 = vld [vmem:[%s2313_s4 + $0x18] sm:$0xf] }
 0x16a   : > { %v623_v60 = vpop.permute.xlu1 %622  ;;  %1720 = vmatprep.subr.msk.bf16.mxu1 %vm399_vm1, %v424_v55  ;;  %v621_v61 = vpop.permute.xlu0 %620  ;;  %v567_v4 = vpack.c.bf16 %v563_v57, %v563_v57  ;;  %v566_v19 = vpack.c.bf16 %v562_v63, %v562_v63  ;;  %v1722_v55 = vld [vmem:[%s2313_s4 + $0x8] sm:$0xf] }
 0x16b   : > { %v625_v0 = vsel %vm624_vm5, %v621_v61, %v623_v60  ;;  %v626_v1 = vsel %vm624_vm5, %v623_v60, %v621_v61  ;;  %v701_v61 = vsel %vm399_vm1, %v695_v25, 0 }
 0x16c   : > { %v635_v5 = vmul.f32 %v2012_v53, %v626_v1  ;;  %v636_v6 = vmul.f32 %v2015_v54, %v625_v0  ;;  %1719 = vmatmul.mubr.msk.bf16.vlgmr.msra.gmra.mrb[0].mxu1 %vm446_vm6, %v1717_v59  ;;  %v572_v39 = vsel %vm399_vm1, %v566_v19, 0  ;;  %v2112_v0 = vld [vmem:[%s2312_s3 + $0x18] ss:$0 sm:$0xff]  ;;  %v1742_v19 = vld [vmem:[%s2313_s4 + $0x20] sm:$0xf] }
 0x16d   : > { %507 = vmatpush1.bf16.msra.mxu1 %v501_v7  ;;  %538 = vmatprep.mubr.bf16.mxu1 %v1816_v2 }
 0x16e   : > { %v639_v8 = vpack.c.bf16 %v635_v5, %v635_v5  ;;  %v640_v9 = vpack.c.bf16 %v636_v6, %v636_v6  ;;  %v752_v10 = vpop.permute.xlu1 %751  ;;  %1723 = vmatprep.subr.msk.bf16.mxu1 %vm399_vm1, %v567_v4  ;;  %v750_v11 = vpop.permute.xlu0 %749  ;;  %v2124_v6 = vld [vmem:[%s2312_s3 + $0x10] ss:$0 sm:$0xff] }
 0x16f   : > { %v754_v12 = vsel %vm753_vm7, %v750_v11, %v752_v10  ;;  %v755_v14 = vsel %vm753_vm7, %v752_v10, %v750_v11 }
 0x170   : > { %v764_v22 = vmul.f32 %v2028_v62, %v754_v12  ;;  %v765_v24 = vmul.f32 %v2036_v3, %v755_v14  ;;  %1726 = vmatprep.subr.msk.bf16.mxu0 %vm399_vm1, %v640_v9  ;;  %v645_v26 = vsel %vm399_vm1, %v639_v8, 0  ;;  %v1728_v8 = vld [vmem:[%s2313_s4 + $0x10] sm:$0xf]  ;;  %v1737_v9 = vld [vmem:[%s2313_s4 + $0x1c] sm:$0xf] }
 0x171   : > { %651 = vmatpush1.bf16.msra.mxu0 %v645_v26 }
 0x172   : > { %v768_v28 = vpack.c.bf16 %v764_v22, %v764_v22  ;;  %v769_v33 = vpack.c.bf16 %v765_v24, %v765_v24  ;;  %v825_v34 = vpop.permute.xlu1 %824  ;;  %v823_v20 = vpop.permute.xlu0 %822 }
 0x173   : > { %v828_v43 = vsel %vm826_vm8, %v825_v34, %v823_v20  ;;  %v827_v52 = vsel %vm826_vm8, %v823_v20, %v825_v34 }
 0x174   : > { %1721 = vmatmul.mubr.msk.bf16.vlgmr.msra.gmra.mrb[4].mxu1 %vm446_vm6, %v422_v27  ;;  %1732 = vmatprep.subr.msk.bf16.mxu0 %vm399_vm1, %v769_v33  ;;  %v774_v40 = vsel %vm399_vm1, %v768_v28, 0  ;;  %v838_v49 = vmul.f32 %v2062_v37, %v828_v43  ;;  %v837_v59 = vmul.f32 %v2090_v48, %v827_v52 }
 0x175   : > { %578 = vmatpush1.bf16.msra.mxu1 %v572_v39  ;;  %1727 = vmatmul.mubr.msk.bf16.vlgmr.msra.gmra.mrb[4].mxu0 %vm446_vm6, %v1725_v36 }
 0x176   : > { %1729 = vmatprep.subr.msk.bf16.mxu1 %vm399_vm1, %v696_v38  ;;  %780 = vmatpush1.bf16.msra.mxu0 %v774_v40  ;;  %v898_v17 = vpop.permute.xlu1 %897  ;;  %v896_v44 = vpop.permute.xlu0 %895  ;;  %v842_v60 = vpack.c.bf16 %v838_v49, %v838_v49  ;;  %v841_v4 = vpack.c.bf16 %v837_v59, %v837_v59 }
 0x177   : > { %v900_v46 = vsel %vm899_vm9, %v896_v44, %v898_v17  ;;  %v901_v47 = vsel %vm899_vm9, %v898_v17, %v896_v44  ;;  %609 = vmatprep.mubr.bf16.mxu1 %v1816_v2  ;;  %811 = vmatprep.mubr.bf16.mxu0 %v1816_v2 }
 0x178   : > { %v910_v50 = vmul.f32 %v2072_v41, %v900_v46  ;;  %v911_v51 = vmul.f32 %v2075_v42, %v901_v47  ;;  %v847_v12 = vsel %vm399_vm1, %v841_v4, 0 }
 0x17a   : > { %v914_v56 = vpack.c.bf16 %v910_v50, %v910_v50  ;;  %v915_v13 = vpack.c.bf16 %v911_v51, %v911_v51  ;;  %v971_v57 = vpop.permute.xlu1 %970  ;;  %v969_v23 = vpop.permute.xlu0 %968 }
 0x17b   : > { %v974_v1 = vsel %vm972_vm10, %v971_v57, %v969_v23  ;;  %v973_v7 = vsel %vm972_vm10, %v969_v23, %v971_v57 }
 0x17c   : > { %1724 = vmatmul.mubr.msk.bf16.vlgmr.msra.gmra.mrb[8].mxu1 %vm446_vm6, %v1722_v55  ;;  %1738 = vmatprep.subr.msk.bf16.mxu0 %vm399_vm1, %v915_v13  ;;  %v920_v63 = vsel %vm399_vm1, %v914_v56, 0  ;;  %v984_v5 = vmul.f32 %v2112_v0, %v974_v1  ;;  %v983_v10 = vmul.f32 %v2124_v6, %v973_v7 }
 0x17d   : > { %707 = vmatpush1.bf16.msra.mxu1 %v701_v61  ;;  %1733 = vmatmul.mubr.msk.bf16.vlgmr.msra.gmra.mrb[8].mxu0 %vm446_vm6, %v1731_v58 }
 0x17e   : > { %1735 = vmatprep.subr.msk.bf16.mxu1 %vm399_vm1, %v842_v60  ;;  %926 = vmatpush1.bf16.msra.mxu0 %v920_v63  ;;  %v988_v11 = vpack.c.bf16 %v984_v5, %v984_v5  ;;  %v987_v14 = vpack.c.bf16 %v983_v10, %v983_v10 }
 0x17f   : > { %738 = vmatprep.mubr.bf16.mxu1 %v1816_v2  ;;  %957 = vmatprep.mubr.bf16.mxu0 %v1816_v2 }
 0x180   : > { %v993_v16 = vsel %vm399_vm1, %v987_v14, 0 }
 0x184   : > { %1730 = vmatmul.mubr.msk.bf16.vlgmr.msra.gmra.mrb[12].mxu1 %vm446_vm6, %v1728_v8 }
 0x185   : > { %853 = vmatpush1.bf16.msra.mxu1 %v847_v12  ;;  %884 = vmatprep.mubr.bf16.mxu1 %v1816_v2 }
 0x186   : > { %1743 = vmatprep.subr.msk.bf16.mxu1 %vm399_vm1, %v988_v11  ;;  %1739 = vmatmul.mubr.msk.bf16.vlgmr.msra.gmra.mrb[12].mxu0 %vm446_vm6, %v1737_v9 }
 0x187   : > { %1118 = vmatprep.mubr.bf16.mxu0 %v1816_v2 }
 0x18c   : > { %1736 = vmatmul.mubr.msk.bf16.vlgmr.msra.gmra.mrb[16].mxu1 %vm446_vm6, %v1734_v15 }
 0x18d   : > { %999 = vmatpush1.bf16.msra.mxu1 %v993_v16  ;;  %1030 = vmatprep.mubr.bf16.mxu1 %v1816_v2 }
 0x194   : > { %1744 = vmatmul.mubr.msk.bf16.vlgmr.msra.gmra.mrb[20].mxu1 %vm446_vm6, %v1742_v19 }
 0x195   : > { %1168 = vmatprep.mubr.bf16.mxu1 %v1816_v2 }
 0x23f   : > { %v490_v22 = vpop.f32.mrb[0].mxu1 }
 0x240   : > { %v492_v24 = vpop.f32.mrb[1].mxu1 }
 0x241   : > { %v494_v26 = vpop.f32.mrb[2].mxu1 }
 0x242   : > { %v495_v27 = vpop.f32.mrb[3].mxu1  ;;  %v1044_v26 = vpop.permute.xlu0 %1043 }
 0x247   : > { %v540_v28 = vpop.f32.mrb[4].mxu1 }
 0x248   : > { %v541_v33 = vadd.f32 %v540_v28, %v490_v22  ;;  %v542_v34 = vpop.f32.mrb[5].mxu1  ;;  %v684_v20 = vpop.f32.mrb[4].mxu0 }
 0x249   : > { %v543_v36 = vadd.f32 %v542_v34, %v492_v24  ;;  %v544_v38 = vpop.f32.mrb[6].mxu1  ;;  %v686_v39 = vpop.f32.mrb[5].mxu0 }
 0x24a   : > { %v545_v40 = vpop.f32.mrb[7].mxu1  ;;  %v688_v43 = vpop.f32.mrb[6].mxu0 }
 0x24b   : > { %v689_v17 = vpop.f32.mrb[7].mxu0 }
 0x24f   : > { %v611_v44 = vpop.f32.mrb[8].mxu1 }
 0x250   : > { %v618_v46 = vadd.f32 %v611_v44, %v541_v33  ;;  %v613_v47 = vpop.f32.mrb[9].mxu1  ;;  %v813_v25 = vpop.f32.mrb[8].mxu0  ;;  %v1825_v44 = vmov 1  }
 0x251   : > { %v619_v49 = vadd.f32 %v613_v47, %v543_v36  ;;  %v615_v50 = vpop.f32.mrb[10].mxu1  ;;  %v815_v51 = vpop.f32.mrb[9].mxu0  ;;  %1794 = vset.pattern.permute.xlu0 %v1825_v44 }
 0x252   : > { %v691_v52 = vadd.f32 %v684_v20, %v618_v46  ;;  %v616_v55 = vpop.f32.mrb[11].mxu1  ;;  %v817_v56 = vpop.f32.mrb[10].mxu0 }
 0x253   : > { %v692_v13 = vadd.f32 %v686_v39, %v619_v49  ;;  %v818_v57 = vpop.f32.mrb[11].mxu0 }
 0x257   : > { %v740_v23 = vpop.f32.mrb[12].mxu1 }
 0x258   : > { %v747_v58 = vadd.f32 %v740_v23, %v691_v52  ;;  %v742_v59 = vpop.f32.mrb[13].mxu1 }
 0x259   : > { %v748_v60 = vadd.f32 %v742_v59, %v692_v13  ;;  %v744_v61 = vpop.f32.mrb[14].mxu1  ;;  %v959_v63 = vpop.f32.mrb[12].mxu0 }
 0x25a   : > { %v820_v1 = vadd.f32 %v813_v25, %v747_v58  ;;  %v745_v4 = vpop.f32.mrb[15].mxu1  ;;  %v961_v5 = vpop.f32.mrb[13].mxu0 }
 0x25b   : > { %v821_v7 = vadd.f32 %v815_v51, %v748_v60  ;;  %v963_v8 = vpop.f32.mrb[14].mxu0 }
 0x25c   : > { %v964_v9 = vpop.f32.mrb[15].mxu0 }
 0x25d   : > { %v1062_v9 = vld [vmem:[%s2314_s5] sm:$0xf] }
 0x25f   : > { %v886_v10 = vpop.f32.mrb[16].mxu1 }
 0x260   : > { %v893_v11 = vadd.f32 %v886_v10, %v820_v1  ;;  %v888_v12 = vpop.f32.mrb[17].mxu1 }
 0x261   : > { %v894_v14 = vadd.f32 %v888_v12, %v821_v7  ;;  %v890_v15 = vpop.f32.mrb[18].mxu1 }
 0x262   : > { %v966_v16 = vadd.f32 %v959_v63, %v893_v11  ;;  %v891_v19 = vpop.f32.mrb[19].mxu1 }
 0x263   : > { %v967_v22 = vadd.f32 %v961_v5, %v894_v14 }
 0x267   : > { %v1032_v24 = vpop.f32.mrb[20].mxu1 }
 0x268   : > { %v1039_v27 = vadd.f32 %v1032_v24, %v966_v16  ;;  %v1034_v28 = vpop.f32.mrb[21].mxu1  ;;  %v1750_v24 = vld [vmem:[%s2314_s5 + $0x8] sm:$0xf] }
 0x269   : > { %v1040_v33 = vadd.f32 %v1034_v28, %v967_v22  ;;  %v1036_v34 = vpop.f32.mrb[22].mxu1 }
 0x26a   : > { %v1046_v20 = vadd.f32 %v1044_v26, %v1039_v27  ;;  %v1037_v36 = vpop.f32.mrb[23].mxu1 }
 0x26b   : > { %v1047_v38 = vadd.f32 %v1044_v26, %v1040_v33 }
 0x26c   : > { %vm1048_vm11 = vcmp.ge.f32.partialorder %v1046_v20, 0.0  ;;  %v1050_v39 = vmul.f32 0.01, %v1046_v20 }
 0x26d   : > { %v1051_v40 = vmul.f32 0.01, %v1047_v38  ;;  %vm1049_vm12 = vcmp.ge.f32.partialorder %v1047_v38, 0.0 }
 0x26e   : > { %v2152_v43 = vsel %vm1048_vm11, %v1046_v20, %v1050_v39  ;;  %v1753_v39 = vld [vmem:[%s2314_s5 + $0xc] sm:$0xf] }
 0x26f   : > { %1054 = vrot.lane.b32.xlu0 %v2152_v43, %s1817_s29  ;;  %1065 = vrot.lane.b32.xlu1 %v2152_v43, %s1818_s30  ;;  %v2158_v17 = vsel %vm1049_vm12, %v1047_v38, %v1051_v40  ;;  %v1307_v14 = vpack.c.bf16 %v2152_v43, %v2152_v43 }
 0x270   : > { %v1308_v22 = vpack.c.bf16 %v2158_v17, %v2158_v17 }
 0x271   : > { %v1313_v38 = vsel %vm399_vm1, %v1307_v14, 0 }
 0x273   : > { %1177 = vrot.lane.b32.xlu0 %v2152_v43, %s1819_s8  ;;  %1067 = vrot.lane.b32.xlu1 %v2158_v17, %s1818_s30 }
 0x277   : > { %1241 = vrot.lane.b32.xlu0 %v2152_v43, %s1820_s9  ;;  %1056 = vrot.lane.b32.xlu1 %v2158_v17, %s1817_s29  ;;  %s295_s29 = scalar_lea.vmem %s2316_s7, %s1774_s28 }
 0x27b   : > { %1361 = vrot.lane.b32.xlu0 %v2152_v43, %s1821_s10  ;;  %1179 = vrot.lane.b32.xlu1 %v2158_v17, %s1819_s8 }
 0x27f   : > { %1425 = vrot.lane.b32.xlu0 %v2152_v43, %s1822_s11  ;;  %1243 = vrot.lane.b32.xlu1 %v2158_v17, %s1820_s9 }
 0x283   : > { %1489 = vrot.lane.b32.xlu0 %v2152_v43, %s1823_s12  ;;  %1363 = vrot.lane.b32.xlu1 %v2158_v17, %s1821_s10 }
 0x287   : > { %1553 = vrot.lane.b32.xlu0 %v2152_v43, %s1824_s13  ;;  %1427 = vrot.lane.b32.xlu1 %v2158_v17, %s1822_s11 }
 0x28b   : > { %1491 = vrot.lane.b32.xlu1 %v2158_v17, %s1823_s12  ;;  %1618 = vperm.xlu0 %1794, %v1953_v18  }
 0x28f   : > { %1555 = vrot.lane.b32.xlu1 %v2158_v17, %s1824_s13 }
 0x2e1   : > { %v1055_v46 = vpop.permute.xlu0 %1054  ;;  %v1066_v47 = vpop.permute.xlu1 %1065 }
 0x2e5   : > { %v1178_v25 = vpop.permute.xlu0 %1177  ;;  %v1068_v49 = vpop.permute.xlu1 %1067 }
 0x2e6   : > { %v1069_v50 = vsel %vm429_vm3, %v1066_v47, %v1068_v49  ;;  %v1070_v51 = vsel %vm429_vm3, %v1068_v49, %v1066_v47  ;;  %v1756_v49 = vld [vmem:[%s2314_s5 + $0x10] sm:$0xf] }
 0x2e7   : > { %v1071_v52 = vmul.f32 %v1070_v51, %v1982_v31  ;;  %v1072_v55 = vmul.f32 %v1069_v50, %v1985_v32  ;;  %v1745_v32 = vld [vmem:[%s2314_s5 + $0x4] sm:$0xf] }
 0x2e9   : > { %v1075_v56 = vpack.c.bf16 %v1071_v52, %v1071_v52  ;;  %v1076_v13 = vpack.c.bf16 %v1072_v55, %v1072_v55  ;;  %v1242_v57 = vpop.permute.xlu0 %1241  ;;  %v1057_v23 = vpop.permute.xlu1 %1056 }
 0x2ea   : > { %v1058_v18 = vsel %vm409_vm2, %v1055_v46, %v1057_v23  ;;  %v1059_v58 = vsel %vm409_vm2, %v1057_v23, %v1055_v46 }
 0x2eb   : > { %v1060_v59 = vmul.f32 %v1059_v58, %v1975_v29  ;;  %v1061_v60 = vmul.f32 %v1058_v18, %v1978_v30  ;;  %1746 = vmatprep.subr.msk.bf16.mxu0 %vm399_vm1, %v1076_v13  ;;  %v1081_v31 = vsel %vm399_vm1, %v1075_v56, 0 }
 0x2ec   : > { %1087 = vmatpush1.bf16.msra.mxu0 %v1081_v31 }
 0x2ed   : > { %v1063_v61 = vpack.c.bf16 %v1060_v59, %v1060_v59  ;;  %v1064_v63 = vpack.c.bf16 %v1061_v60, %v1061_v60  ;;  %v1180_v1 = vpop.permute.xlu1 %1179  ;;  %v1362_v5 = vpop.permute.xlu0 %1361 }
 0x2ee   : > { %v1181_v4 = vsel %vm551_vm4, %v1178_v25, %v1180_v1  ;;  %v1182_v29 = vsel %vm551_vm4, %v1180_v1, %v1178_v25  ;;  %v1768_v1 = vld [vmem:[%s2314_s5 + $0x20] sm:$0xf] }
 0x2ef   : > { %v1183_v30 = vmul.f32 %v1182_v29, %v2005_v45  ;;  %v1184_v7 = vmul.f32 %v1181_v4, %v1989_v35  ;;  %1747 = vmatmul.mubr.msk.bf16.vlgmr.msra.gmra.mrb[16].mxu0 %vm446_vm6, %v1745_v32  ;;  %1748 = vmatprep.subr.msk.bf16.mxu1 %vm399_vm1, %v1064_v63  ;;  %v1131_v8 = vsel %vm399_vm1, %v1063_v61, 0  ;;  %v1762_v61 = vld [vmem:[%s2314_s5 + $0x18] sm:$0xf] }
 0x2f0   : > { %1137 = vmatpush1.bf16.msra.mxu1 %v1131_v8  ;;  %1230 = vmatprep.mubr.bf16.mxu0 %v1816_v2 }
 0x2f1   : > { %v1187_v10 = vpack.c.bf16 %v1183_v30, %v1183_v30  ;;  %v1188_v11 = vpack.c.bf16 %v1184_v7, %v1184_v7  ;;  %v1244_v12 = vpop.permute.xlu1 %1243  ;;  %v1426_v26 = vpop.permute.xlu0 %1425 }
 0x2f2   : > { %v1245_v45 = vsel %vm624_vm5, %v1242_v57, %v1244_v12  ;;  %v1246_v35 = vsel %vm624_vm5, %v1244_v12, %v1242_v57  ;;  %v1759_v57 = vld [vmem:[%s2314_s5 + $0x14] sm:$0xf] }
 0x2f3   : > { %v1247_v15 = vmul.f32 %v1246_v35, %v2012_v53  ;;  %v1248_v16 = vmul.f32 %v1245_v45, %v2015_v54  ;;  %1749 = vmatmul.mubr.msk.bf16.vlgmr.msra.gmra.mrb[24].mxu1 %vm446_vm6, %v1062_v9  ;;  %1751 = vmatprep.subr.msk.bf16.mxu0 %vm399_vm1, %v1188_v11  ;;  %v1193_v19 = vsel %vm399_vm1, %v1187_v10, 0 }
 0x2f4   : > { %1199 = vmatpush1.bf16.msra.mxu0 %v1193_v19  ;;  %1294 = vmatprep.mubr.bf16.mxu1 %v1816_v2 }
 0x2f5   : > { %v1251_v53 = vpack.c.bf16 %v1247_v15, %v1247_v15  ;;  %v1252_v27 = vpack.c.bf16 %v1248_v16, %v1248_v16  ;;  %v1364_v54 = vpop.permute.xlu1 %1363  ;;  %1757 = vmatprep.subr.msk.bf16.mxu0 %vm399_vm1, %v1308_v22  ;;  %v1490_v44 = vpop.permute.xlu0 %1489 }
 0x2f6   : > { %v1365_v28 = vsel %vm753_vm7, %v1362_v5, %v1364_v54  ;;  %v1366_v33 = vsel %vm753_vm7, %v1364_v54, %v1362_v5 }
 0x2f7   : > { %v1367_v34 = vmul.f32 %v1365_v28, %v2028_v62  ;;  %v1368_v20 = vmul.f32 %v1366_v33, %v2036_v3  ;;  %1752 = vmatmul.mubr.msk.bf16.vlgmr.msra.gmra.mrb[20].mxu0 %vm446_vm6, %v1750_v24  ;;  %1754 = vmatprep.subr.msk.bf16.mxu1 %vm399_vm1, %v1252_v27  ;;  %v1257_v36 = vsel %vm399_vm1, %v1251_v53, 0 }
 0x2f8   : > { %1263 = vmatpush1.bf16.msra.mxu1 %v1257_v36  ;;  %1319 = vmatpush1.bf16.msra.mxu0 %v1313_v38 }
 0x2f9   : > { %v1371_v40 = vpack.c.bf16 %v1367_v34, %v1367_v34  ;;  %v1372_v43 = vpack.c.bf16 %v1368_v20, %v1368_v20  ;;  %v1428_v17 = vpop.permute.xlu1 %1427  ;;  %1350 = vmatprep.mubr.bf16.mxu0 %v1816_v2  ;;  %v1554_v23 = vpop.permute.xlu0 %1553 }
 0x2fa   : > { %v1429_v62 = vsel %vm826_vm8, %v1426_v26, %v1428_v17  ;;  %v1430_v3 = vsel %vm826_vm8, %v1428_v17, %v1426_v26 }
 0x2fb   : > { %v1431_v46 = vmul.f32 %v1429_v62, %v2090_v48  ;;  %v1432_v47 = vmul.f32 %v1430_v3, %v2062_v37  ;;  %1755 = vmatmul.mubr.msk.bf16.vlgmr.msra.gmra.mrb[28].mxu1 %vm446_vm6, %v1753_v39  ;;  %1760 = vmatprep.subr.msk.bf16.mxu1 %vm399_vm1, %v1372_v43  ;;  %v1377_v25 = vsel %vm399_vm1, %v1371_v40, 0 }
 0x2fc   : > { %1383 = vmatpush1.bf16.msra.mxu1 %v1377_v25  ;;  %1414 = vmatprep.mubr.bf16.mxu1 %v1816_v2 }
 0x2fd   : > { %v1435_v50 = vpack.c.bf16 %v1431_v46, %v1431_v46  ;;  %v1436_v51 = vpack.c.bf16 %v1432_v47, %v1432_v47  ;;  %v1492_v52 = vpop.permute.xlu1 %1491 }
 0x2fe   : > { %v1493_v48 = vsel %vm899_vm9, %v1490_v44, %v1492_v52  ;;  %v1494_v37 = vsel %vm899_vm9, %v1492_v52, %v1490_v44 }
 0x2ff   : > { %v1495_v55 = vmul.f32 %v1493_v48, %v2072_v41  ;;  %v1496_v56 = vmul.f32 %v1494_v37, %v2075_v42  ;;  %1758 = vmatmul.mubr.msk.bf16.vlgmr.msra.gmra.mrb[24].mxu0 %vm446_vm6, %v1756_v49  ;;  %1763 = vmatprep.subr.msk.bf16.mxu0 %vm399_vm1, %v1436_v51  ;;  %v1441_v13 = vsel %vm399_vm1, %v1435_v50, 0 }
 0x300   : > { %1447 = vmatpush1.bf16.msra.mxu0 %v1441_v13  ;;  %1478 = vmatprep.mubr.bf16.mxu0 %v1816_v2 }
 0x301   : > { %v1499_v18 = vpack.c.bf16 %v1495_v55, %v1495_v55  ;;  %v1500_v58 = vpack.c.bf16 %v1496_v56, %v1496_v56  ;;  %v1556_v59 = vpop.permute.xlu1 %1555 }
 0x302   : > { %v1557_v41 = vsel %vm972_vm10, %v1554_v23, %v1556_v59  ;;  %v1558_v42 = vsel %vm972_vm10, %v1556_v59, %v1554_v23 }
 0x303   : > { %v1559_v60 = vmul.f32 %v2124_v6, %v1557_v41  ;;  %v1560_v31 = vmul.f32 %v2112_v0, %v1558_v42  ;;  %1761 = vmatmul.mubr.msk.bf16.vlgmr.msra.gmra.mrb[32].mxu1 %vm446_vm6, %v1759_v57  ;;  %1766 = vmatprep.subr.msk.bf16.mxu1 %vm399_vm1, %v1500_v58  ;;  %v1505_v32 = vsel %vm399_vm1, %v1499_v18, 0  ;;  %v1765_v6 = vld [vmem:[%s2314_s5 + $0x1c] sm:$0xf] }
 0x304   : > { %1511 = vmatpush1.bf16.msra.mxu1 %v1505_v32  ;;  %1542 = vmatprep.mubr.bf16.mxu1 %v1816_v2 }
 0x305   : > { %v1563_v63 = vpack.c.bf16 %v1559_v60, %v1559_v60  ;;  %v1564_v21 = vpack.c.bf16 %v1560_v31, %v1560_v31 }
 0x307   : > { %1764 = vmatmul.mubr.msk.bf16.vlgmr.msra.gmra.mrb[28].mxu0 %vm446_vm6, %v1762_v61  ;;  %1769 = vmatprep.subr.msk.bf16.mxu0 %vm399_vm1, %v1564_v21  ;;  %v1569_v0 = vsel %vm399_vm1, %v1563_v63, 0 }
 0x308   : > { %1575 = vmatpush1.bf16.msra.mxu0 %v1569_v0  ;;  %1606 = vmatprep.mubr.bf16.mxu0 %v1816_v2 }
 0x30a   : > { %v1619_v13 = vpop.permute.xlu0 %1618 }
 0x30b   : > { %1767 = vmatmul.mubr.msk.bf16.vlgmr.msra.gmra.mrb[36].mxu1 %vm446_vm6, %v1765_v6 }
 0x30f   : > { %1770 = vmatmul.mubr.msk.bf16.vlgmr.msra.gmra.mrb[32].mxu0 %vm446_vm6, %v1768_v1 }
 0x3c2   : > { %v1120_v4 = vpop.f32.mrb[16].mxu0 }
 0x3c3   : > { %v1122_v29 = vpop.f32.mrb[17].mxu0 }
 0x3c4   : > { %v1124_v5 = vpop.f32.mrb[18].mxu0 }
 0x3c5   : > { %v1125_v30 = vpop.f32.mrb[19].mxu0 }
 0x3c6   : > { %v1170_v7 = vpop.f32.mrb[24].mxu1 }
 0x3c7   : > { %v1171_v8 = vadd.f32 %v1170_v7, %v1120_v4  ;;  %v1172_v9 = vpop.f32.mrb[25].mxu1 }
 0x3c8   : > { %v1173_v10 = vadd.f32 %v1172_v9, %v1122_v29  ;;  %v1174_v11 = vpop.f32.mrb[26].mxu1 }
 0x3c9   : > { %v1175_v12 = vpop.f32.mrb[27].mxu1 }
 0x3ca   : > { %v1232_v45 = vpop.f32.mrb[20].mxu0 }
 0x3cb   : > { %v1239_v2 = vadd.f32 %v1232_v45, %v1171_v8  ;;  %v1234_v35 = vpop.f32.mrb[21].mxu0 }
 0x3cc   : > { %v1240_v14 = vadd.f32 %v1234_v35, %v1173_v10  ;;  %v1236_v15 = vpop.f32.mrb[22].mxu0 }
 0x3cd   : > { %v1237_v16 = vpop.f32.mrb[23].mxu0 }
 0x3ce   : > { %v1296_v19 = vpop.f32.mrb[28].mxu1 }
 0x3cf   : > { %v1303_v22 = vadd.f32 %v1296_v19, %v1239_v2  ;;  %v1298_v24 = vpop.f32.mrb[29].mxu1 }
 0x3d0   : > { %v1304_v26 = vadd.f32 %v1298_v24, %v1240_v14  ;;  %v1300_v53 = vpop.f32.mrb[30].mxu1 }
 0x3d1   : > { %v1301_v27 = vpop.f32.mrb[31].mxu1 }
 0x3d2   : > { %v1352_v54 = vpop.f32.mrb[24].mxu0 }
 0x3d3   : > { %v1359_v28 = vadd.f32 %v1352_v54, %v1303_v22  ;;  %v1354_v33 = vpop.f32.mrb[25].mxu0 }
 0x3d4   : > { %v1360_v34 = vadd.f32 %v1354_v33, %v1304_v26  ;;  %v1356_v20 = vpop.f32.mrb[26].mxu0 }
 0x3d5   : > { %v1357_v36 = vpop.f32.mrb[27].mxu0 }
 0x3d6   : > { %v1416_v38 = vpop.f32.mrb[32].mxu1 }
 0x3d7   : > { %v1423_v39 = vadd.f32 %v1416_v38, %v1359_v28  ;;  %v1418_v40 = vpop.f32.mrb[33].mxu1 }
 0x3d8   : > { %v1424_v43 = vadd.f32 %v1418_v40, %v1360_v34  ;;  %v1420_v17 = vpop.f32.mrb[34].mxu1 }
 0x3d9   : > { %v1421_v62 = vpop.f32.mrb[35].mxu1 }
 0x3da   : > { %v1480_v3 = vpop.f32.mrb[28].mxu0 }
 0x3db   : > { %v1487_v44 = vadd.f32 %v1480_v3, %v1423_v39  ;;  %v1482_v46 = vpop.f32.mrb[29].mxu0 }
 0x3dc   : > { %v1488_v47 = vadd.f32 %v1482_v46, %v1424_v43  ;;  %v1484_v25 = vpop.f32.mrb[30].mxu0 }
 0x3dd   : > { %v1485_v49 = vpop.f32.mrb[31].mxu0 }
 0x3de   : > { %v1544_v50 = vpop.f32.mrb[36].mxu1 }
 0x3df   : > { %v1551_v51 = vadd.f32 %v1544_v50, %v1487_v44  ;;  %v1546_v52 = vpop.f32.mrb[37].mxu1 }
 0x3e0   : > { %v1552_v48 = vadd.f32 %v1546_v52, %v1488_v47  ;;  %v1548_v37 = vpop.f32.mrb[38].mxu1 }
 0x3e1   : > { %v1549_v55 = vpop.f32.mrb[39].mxu1 }
 0x3e2   : > { %v1608_v56 = vpop.f32.mrb[32].mxu0 }
 0x3e3   : > { %v1615_v57 = vadd.f32 %v1608_v56, %v1551_v51  ;;  %v1610_v23 = vpop.f32.mrb[33].mxu0 }
 0x3e4   : > { %v1616_v18 = vadd.f32 %v1610_v23, %v1552_v48  ;;  %v1612_v58 = vpop.f32.mrb[34].mxu0 }
 0x3e5   : > { %v1621_v59 = vadd.f32 %v1619_v13, %v1615_v57  ;;  %v1613_v41 = vpop.f32.mrb[35].mxu0 }
 0x3e6   : > { %v1622_v42 = vadd.f32 %v1619_v13, %v1616_v18 }
 0x3e7   : > { %vm1623_vm13 = vcmp.ge.f32.partialorder %v1621_v59, 0.0  ;;  %v1625_v60 = vmul.f32 0.01, %v1621_v59 }
 0x3e8   : > { %vm1624_vm14 = vcmp.ge.f32.partialorder %v1622_v42, 0.0  ;;  %v1626_v31 = vmul.f32 0.01, %v1622_v42 }
 0x3e9   : > { %v1627_v32 = vsel %vm1623_vm13, %v1621_v59, %v1625_v60 }
 0x3ea   : > { %v1628_v61 = vsel %vm1624_vm14, %v1622_v42, %v1626_v31  ;;  %1629 = vst [vmem:[%s295_s29] sm:$0xff] %v1627_v32 }
 0x3eb   : > { %1630 = vst [vmem:[%s295_s29 + $0x8] sm:$0xff] %v1628_v61 }
 0x3ec PF: > { %s17_s24 = sadd.s32 1, %s1814_s24  }
 0x3ed   : > { %p14_p4 = scmp.ge.s32.totalorder %s17_s24, 4  }
 0x3ef   :  { %16 = sbr.rel (!%p14_p4) target bundleno = 1 (0x1), region = 97 }

</bundles_post_ra>
